<compile_context>
chip_gen: v6e
topology: v6e:2x2x1
jax: 0.10.0
libtpu: 0.0.40
codegen_flags: <defaults>
</compile_context>

<pallas_src>
import jax
import jax.numpy as jnp
from jax.experimental import pallas as pl
from jax.experimental.pallas import tpu as pltpu


def _round_up(x, m):
    return ((x + m - 1) // m) * m


def attention_cell_kernel(
    batch_H_ref,   # (Bt, T, D_in)
    h_ref,         # (Bt, H)
    c_ref,         # (Bt, H)
    onehot_ref,    # (Bt, E)
    w_i2h_ref,     # (D_in, H)          i2h.weight.T
    w_h2h_ref,     # (H, H)             h2h.weight.T
    b_h2h_ref,     # (1, H)
    w_score_ref,   # (1, H)             score.weight as a row (VPU reduce, not MXU)
    w_cat_ref,     # (D_in + E + H, 4H) [w_ih_x.T ; w_ih_e.T ; w_hh.T]
    b_gate_ref,    # (1, 4H)            b_ih + b_hh
    hc_out_ref,    # (Bt, 2H)           [h_new | c_new]
    alpha_out_ref, # (Bt, T)
):
    Bt, T, D_in = batch_H_ref.shape
    H = h_ref.shape[-1]

    bh = batch_H_ref[...]            # (Bt, T, D_in)
    h = h_ref[...]                   # (Bt, H)
    c = c_ref[...]                   # (Bt, H)
    oh = onehot_ref[...]             # (Bt, E)

    # batch_H_proj = i2h(batch_H): one big MXU matmul over the whole batch tile.
    bh_proj = jnp.dot(
        bh.reshape(Bt * T, D_in), w_i2h_ref[...],
        preferred_element_type=jnp.float32,
    ).reshape(Bt, T, H)

    # prev_hidden_proj = h2h(h) broadcast over T.
    h_proj = jnp.dot(h, w_h2h_ref[...], preferred_element_type=jnp.float32) \
        + b_h2h_ref[...]                                         # (Bt, H)

    # e = score(tanh(batch_H_proj + prev_hidden_proj)) as a VPU multiply + lane reduce
    # (avoids a (.., H) @ (H, 1) matmul that would use 1 MXU column).
    t_act = jnp.tanh(bh_proj + h_proj[:, None, :])               # (Bt, T, H)
    e = jnp.sum(t_act * w_score_ref[...].reshape(1, 1, H), axis=-1)  # (Bt, T)

    # softmax over T (lane axis), EUP reciprocal for the denominator.
    e_max = jnp.max(e, axis=-1, keepdims=True)
    p = jnp.exp(e - e_max)
    alpha = p * pl.reciprocal(jnp.sum(p, axis=-1, keepdims=True), approx=True)
    alpha_out_ref[...] = alpha.astype(alpha_out_ref.dtype)       # (Bt, T)

    # context = bmm(alpha^T, batch_H) as a VPU weighted sum over T.
    context = jnp.sum(alpha[:, :, None] * bh, axis=1)            # (Bt, D_in)

    # LSTMCell on concat([context, char_onehots]) with hidden h:
    # single fused matmul with concatenated weights, one pre-summed bias.
    x_cat = jnp.concatenate([context, oh, h], axis=-1)           # (Bt, D_in+E+H)
    gates = jnp.dot(x_cat, w_cat_ref[...],
                    preferred_element_type=jnp.float32) + b_gate_ref[...]  # (Bt, 4H)

    i_g = jax.nn.sigmoid(gates[:, 0 * H:1 * H])
    f_g = jax.nn.sigmoid(gates[:, 1 * H:2 * H])
    g_g = jnp.tanh(gates[:, 2 * H:3 * H])
    o_g = jax.nn.sigmoid(gates[:, 3 * H:4 * H])

    c_new = f_g * c + i_g * g_g
    h_new = o_g * jnp.tanh(c_new)

    hc_out_ref[...] = jnp.concatenate([h_new, c_new], axis=-1).astype(hc_out_ref.dtype)


def attention_cell(prev_hidden, batch_H, char_onehots, params, *, block_b=256):
    """prev_hidden = (h, c) each [B, H]; batch_H [B, T, D_in]; char_onehots [B, E]."""
    h0, c0 = prev_hidden
    B, T, D_in = batch_H.shape
    H = h0.shape[-1]
    E = char_onehots.shape[-1]

    # Batch tile: multiple of 8 sublanes, capped at block_b (use block_b<=128 on v5e,
    # or ~ceil(B/2) rounded to 8 on v7x to keep both TensorCores busy).
    Bt = min(_round_up(B, 8), block_b)
    B_pad = _round_up(B, Bt)
    if B_pad != B:
        pad = B_pad - B
        batch_H_p = jnp.pad(batch_H, ((0, pad), (0, 0), (0, 0)))
        h0_p = jnp.pad(h0, ((0, pad), (0, 0)))
        c0_p = jnp.pad(c0, ((0, pad), (0, 0)))
        oh_p = jnp.pad(char_onehots, ((0, pad), (0, 0)))
    else:
        batch_H_p, h0_p, c0_p, oh_p = batch_H, h0, c0, char_onehots

    # Pre-transpose / fuse weights so the kernel does plain x @ W matmuls.
    w_i2h_t = params["w_i2h"].T                              # (D_in, H)
    w_h2h_t = params["w_h2h"].T                              # (H, H)
    b_h2h = params["b_h2h"].reshape(1, H)                    # (1, H)
    w_score_row = params["w_score"].reshape(1, H)            # (1, H)
    w_ih = params["w_ih"]                                    # (4H, D_in + E)
    w_cat = jnp.concatenate(
        [w_ih[:, :D_in].T, w_ih[:, D_in:].T, params["w_hh"].T], axis=0
    )                                                        # (D_in + E + H, 4H)
    b_gate = (params["b_ih"] + params["b_hh"]).reshape(1, 4 * H)

    full2 = lambda shape: pl.BlockSpec(shape, lambda b: (0, 0))

    grid_spec = pltpu.PrefetchScalarGridSpec(
        num_scalar_prefetch=0,
        grid=(B_pad // Bt,),
        in_specs=[
            pl.BlockSpec((Bt, T, D_in), lambda b: (b, 0, 0)),  # batch_H
            pl.BlockSpec((Bt, H), lambda b: (b, 0)),           # h
            pl.BlockSpec((Bt, H), lambda b: (b, 0)),           # c
            pl.BlockSpec((Bt, E), lambda b: (b, 0)),           # char_onehots
            full2((D_in, H)),                                  # w_i2h_t
            full2((H, H)),                                     # w_h2h_t
            full2((1, H)),                                     # b_h2h
            full2((1, H)),                                     # w_score_row
            full2((D_in + E + H, 4 * H)),                      # w_cat
            full2((1, 4 * H)),                                 # b_gate
        ],
        out_specs=[
            pl.BlockSpec((Bt, 2 * H), lambda b: (b, 0)),       # [h_new | c_new]
            pl.BlockSpec((Bt, T), lambda b: (b, 0)),           # alpha (lane-dense)
        ],
    )

    hc, alpha_bt = pl.pallas_call(
        attention_cell_kernel,
        out_shape=(
            jax.ShapeDtypeStruct((B_pad, 2 * H), jnp.float32),
            jax.ShapeDtypeStruct((B_pad, T), jnp.float32),
        ),
        grid_spec=grid_spec,
        compiler_params=pltpu.CompilerParams(
            dimension_semantics=("parallel",)),
    )(
        batch_H_p, h0_p, c0_p, oh_p,
        w_i2h_t, w_h2h_t, b_h2h, w_score_row, w_cat, b_gate,
    )

    h_new = hc[:B, :H]
    c_new = hc[:B, H:]
    alpha = alpha_bt[:B].reshape(B, T, 1)   # PyTorch-shaped (B, T, 1)
    return (h_new, c_new), alpha


def attention_cell_ref(prev_hidden, batch_H, char_onehots, params):
    """Pure-JAX reference mirroring the PyTorch forward (LSTMCell path)."""
    h0, c0 = prev_hidden
    H = h0.shape[-1]
    bh_proj = jnp.einsum("btd,hd->bth", batch_H, params["w_i2h"])
    h_proj = (h0 @ params["w_h2h"].T + params["b_h2h"])[:, None, :]
    e = jnp.einsum("bth,oh->bto", jnp.tanh(bh_proj + h_proj), params["w_score"])
    alpha = jax.nn.softmax(e, axis=1)
    context = jnp.einsum("bto,btd->bd", alpha, batch_H)
    x = jnp.concatenate([context, char_onehots], axis=1)
    gates = x @ params["w_ih"].T + params["b_ih"] + h0 @ params["w_hh"].T + params["b_hh"]
    i_g = jax.nn.sigmoid(gates[:, 0 * H:1 * H])
    f_g = jax.nn.sigmoid(gates[:, 1 * H:2 * H])
    g_g = jnp.tanh(gates[:, 2 * H:3 * H])
    o_g = jax.nn.sigmoid(gates[:, 3 * H:4 * H])
    c_new = f_g * c0 + i_g * g_g
    h_new = o_g * jnp.tanh(c_new)
    return (h_new, c_new), alpha


if __name__ == "__main__":
    B, T = 2, 8
    D_in = 32          # input_size
    H = 32             # hidden_size
    E = 16             # num_embeddings

    key = jax.random.PRNGKey(0)
    keys = jax.random.split(key, 12)

    params = {
        "w_i2h":   0.1 * jax.random.normal(keys[0], (H, D_in), jnp.float32),
        "w_h2h":   0.1 * jax.random.normal(keys[1], (H, H), jnp.float32),
        "b_h2h":   0.1 * jax.random.normal(keys[2], (H,), jnp.float32),
        "w_score": 0.1 * jax.random.normal(keys[3], (1, H), jnp.float32),
        "w_ih":    0.1 * jax.random.normal(keys[4], (4 * H, D_in + E), jnp.float32),
        "w_hh":    0.1 * jax.random.normal(keys[5], (4 * H, H), jnp.float32),
        "b_ih":    0.1 * jax.random.normal(keys[6], (4 * H,), jnp.float32),
        "b_hh":    0.1 * jax.random.normal(keys[7], (4 * H,), jnp.float32),
    }

    batch_H = jax.random.normal(keys[8], (B, T, D_in), jnp.float32)
    h0 = jax.random.normal(keys[9], (B, H), jnp.float32)
    c0 = jax.random.normal(keys[10], (B, H), jnp.float32)
    char_ids = jax.random.randint(keys[11], (B,), 0, E)
    char_onehots = jax.nn.one_hot(char_ids, E, dtype=jnp.float32)

    (h_new, c_new), alpha = attention_cell((h0, c0), batch_H, char_onehots, params)
    jax.block_until_ready((h_new, c_new, alpha))

    (h_ref, c_ref), alpha_ref = attention_cell_ref((h0, c0), batch_H, char_onehots, params)
    # Tolerances account for the approx (EUP) reciprocal in the softmax normalizer.
    assert jnp.allclose(alpha, alpha_ref, atol=1e-3, rtol=1e-3)
    assert jnp.allclose(h_new, h_ref, atol=1e-3, rtol=1e-3)
    assert jnp.allclose(c_new, c_ref, atol=1e-3, rtol=1e-3)

    print("KERNEL_OK")
</pallas_src>

<mosaic_0001>
module attributes {stable_mosaic.version = 11 : i64} {
  func.func @attention_cell_kernel(%arg0: i32, %arg1: memref<8x8x32xf32, #tpu.memory_space<vmem>>, %arg2: memref<8x32xf32, #tpu.memory_space<vmem>>, %arg3: memref<8x32xf32, #tpu.memory_space<vmem>>, %arg4: memref<8x16xf32, #tpu.memory_space<vmem>>, %arg5: memref<32x32xf32, #tpu.memory_space<vmem>>, %arg6: memref<32x32xf32, #tpu.memory_space<vmem>>, %arg7: memref<1x32xf32, #tpu.memory_space<vmem>>, %arg8: memref<1x32xf32, #tpu.memory_space<vmem>>, %arg9: memref<80x128xf32, #tpu.memory_space<vmem>>, %arg10: memref<1x128xf32, #tpu.memory_space<vmem>>, %arg11: memref<8x64xf32, #tpu.memory_space<vmem>>, %arg12: memref<8x8xf32, #tpu.memory_space<vmem>>) attributes {dimension_semantics = [#tpu.dimension_semantics<parallel>], iteration_bounds = array<i64: 1>, scalar_prefetch = 0 : i64, scratch_operands = 0 : i64, tpu.core_type = #tpu.core_type<tc>, window_params = [{transform_indices = @transform_0, window_bounds = array<i64: 8, 8, 32>}, {transform_indices = @transform_1, window_bounds = array<i64: 8, 32>}, {transform_indices = @transform_2, window_bounds = array<i64: 8, 32>}, {transform_indices = @transform_3, window_bounds = array<i64: 8, 16>}, {pipeline_mode = #tpu.pipeline_mode<synchronous>, transform_indices = @transform_4, window_bounds = array<i64: 32, 32>}, {pipeline_mode = #tpu.pipeline_mode<synchronous>, transform_indices = @transform_5, window_bounds = array<i64: 32, 32>}, {pipeline_mode = #tpu.pipeline_mode<synchronous>, transform_indices = @transform_6, window_bounds = array<i64: 1, 32>}, {pipeline_mode = #tpu.pipeline_mode<synchronous>, transform_indices = @transform_7, window_bounds = array<i64: 1, 32>}, {pipeline_mode = #tpu.pipeline_mode<synchronous>, transform_indices = @transform_8, window_bounds = array<i64: 80, 128>}, {pipeline_mode = #tpu.pipeline_mode<synchronous>, transform_indices = @transform_9, window_bounds = array<i64: 1, 128>}, {transform_indices = @transform_10, window_bounds = array<i64: 8, 64>}, {transform_indices = @transform_11, window_bounds = array<i64: 8, 8>}]} {
    %c0 = arith.constant 0 : index
    %c0_0 = arith.constant 0 : index
    %c0_1 = arith.constant 0 : index
    %0 = vector.load %arg1[%c0, %c0_0, %c0_1] : memref<8x8x32xf32, #tpu.memory_space<vmem>>, vector<8x8x32xf32>
    %c0_2 = arith.constant 0 : index
    %c0_3 = arith.constant 0 : index
    %1 = vector.load %arg2[%c0_2, %c0_3] : memref<8x32xf32, #tpu.memory_space<vmem>>, vector<8x32xf32>
    %c0_4 = arith.constant 0 : index
    %c0_5 = arith.constant 0 : index
    %2 = vector.load %arg3[%c0_4, %c0_5] : memref<8x32xf32, #tpu.memory_space<vmem>>, vector<8x32xf32>
    %c0_6 = arith.constant 0 : index
    %c0_7 = arith.constant 0 : index
    %3 = vector.load %arg4[%c0_6, %c0_7] : memref<8x16xf32, #tpu.memory_space<vmem>>, vector<8x16xf32>
    %4 = vector.shape_cast %0 : vector<8x8x32xf32> to vector<64x32xf32>
    %c0_8 = arith.constant 0 : index
    %c0_9 = arith.constant 0 : index
    %5 = vector.load %arg5[%c0_8, %c0_9] : memref<32x32xf32, #tpu.memory_space<vmem>>, vector<32x32xf32>
    %cst = arith.constant dense<0.000000e+00> : vector<64x32xf32>
    %6 = tpu.matmul %4, %5, %cst {dimension_numbers = #tpu.dot_dimension_numbers<[1], [0], [0], [1], [0, 0, 1, 1], [], []>} : vector<64x32xf32>, vector<32x32xf32>, vector<64x32xf32> -> vector<64x32xf32>
    %7 = vector.shape_cast %6 : vector<64x32xf32> to vector<8x8x32xf32>
    %c0_10 = arith.constant 0 : index
    %c0_11 = arith.constant 0 : index
    %8 = vector.load %arg6[%c0_10, %c0_11] : memref<32x32xf32, #tpu.memory_space<vmem>>, vector<32x32xf32>
    %cst_12 = arith.constant dense<0.000000e+00> : vector<8x32xf32>
    %9 = tpu.matmul %1, %8, %cst_12 {dimension_numbers = #tpu.dot_dimension_numbers<[1], [0], [0], [1], [0, 0, 1, 1], [], []>} : vector<8x32xf32>, vector<32x32xf32>, vector<8x32xf32> -> vector<8x32xf32>
    %c0_13 = arith.constant 0 : index
    %c0_14 = arith.constant 0 : index
    %10 = vector.load %arg7[%c0_13, %c0_14] : memref<1x32xf32, #tpu.memory_space<vmem>>, vector<1x32xf32>
    %11 = vector.broadcast %10 : vector<1x32xf32> to vector<8x32xf32>
    %12 = arith.addf %9, %11 : vector<8x32xf32>
    %13 = vector.shape_cast %12 : vector<8x32xf32> to vector<8x1x32xf32>
    %14 = vector.broadcast %13 : vector<8x1x32xf32> to vector<8x8x32xf32>
    %15 = arith.addf %7, %14 : vector<8x8x32xf32>
    %16 = math.tanh %15 : vector<8x8x32xf32>
    %c0_15 = arith.constant 0 : index
    %c0_16 = arith.constant 0 : index
    %17 = vector.load %arg8[%c0_15, %c0_16] : memref<1x32xf32, #tpu.memory_space<vmem>>, vector<1x32xf32>
    %18 = vector.shape_cast %17 : vector<1x32xf32> to vector<1x1x32xf32>
    %19 = vector.broadcast %18 : vector<1x1x32xf32> to vector<8x8x32xf32>
    %20 = arith.mulf %16, %19 : vector<8x8x32xf32>
    %cst_17 = arith.constant dense<0.000000e+00> : vector<8x8xf32>
    %21 = vector.multi_reduction <add>, %20, %cst_17 [2] : vector<8x8x32xf32> to vector<8x8xf32>
    %cst_18 = arith.constant dense<0xFF800000> : vector<8xf32>
    %22 = vector.multi_reduction <maximumf>, %21, %cst_18 [1] : vector<8x8xf32> to vector<8xf32>
    %23 = vector.shape_cast %22 : vector<8xf32> to vector<8x1xf32>
    %24 = vector.broadcast %23 : vector<8x1xf32> to vector<8x8xf32>
    %25 = arith.subf %21, %24 : vector<8x8xf32>
    %26 = math.exp %25 : vector<8x8xf32>
    %cst_19 = arith.constant dense<0.000000e+00> : vector<8xf32>
    %27 = vector.multi_reduction <add>, %26, %cst_19 [1] : vector<8x8xf32> to vector<8xf32>
    %28 = vector.shape_cast %27 : vector<8xf32> to vector<8x1xf32>
    %29 = tpu.reciprocal %28 {approx = true} : vector<8x1xf32> -> vector<8x1xf32>
    %30 = vector.broadcast %29 : vector<8x1xf32> to vector<8x8xf32>
    %31 = arith.mulf %26, %30 : vector<8x8xf32>
    %c0_20 = arith.constant 0 : index
    %c0_21 = arith.constant 0 : index
    %32 = vector.load %arg12[%c0_20, %c0_21] : memref<8x8xf32, #tpu.memory_space<vmem>>, vector<8x8xf32>
    tpu.vector_store %arg12[%c0_20, %c0_21], %31 {strides = array<i32>} : memref<8x8xf32, #tpu.memory_space<vmem>>, vector<8x8xf32>,
    %33 = vector.shape_cast %31 : vector<8x8xf32> to vector<8x8x1xf32>
    %34 = vector.broadcast %33 : vector<8x8x1xf32> to vector<8x8x32xf32>
    %35 = arith.mulf %34, %0 : vector<8x8x32xf32>
    %cst_22 = arith.constant dense<0.000000e+00> : vector<8x32xf32>
    %36 = vector.multi_reduction <add>, %35, %cst_22 [1] : vector<8x8x32xf32> to vector<8x32xf32>
    %37 = tpu.concatenate %36, %3, %1 in 1 : vector<8x32xf32>, vector<8x16xf32>, vector<8x32xf32> -> vector<8x80xf32>
    %c0_23 = arith.constant 0 : index
    %c0_24 = arith.constant 0 : index
    %38 = vector.load %arg9[%c0_23, %c0_24] : memref<80x128xf32, #tpu.memory_space<vmem>>, vector<80x128xf32>
    %cst_25 = arith.constant dense<0.000000e+00> : vector<8x128xf32>
    %39 = tpu.matmul %37, %38, %cst_25 {dimension_numbers = #tpu.dot_dimension_numbers<[1], [0], [0], [1], [0, 0, 1, 1], [], []>} : vector<8x80xf32>, vector<80x128xf32>, vector<8x128xf32> -> vector<8x128xf32>
    %c0_26 = arith.constant 0 : index
    %c0_27 = arith.constant 0 : index
    %40 = vector.load %arg10[%c0_26, %c0_27] : memref<1x128xf32, #tpu.memory_space<vmem>>, vector<1x128xf32>
    %41 = vector.broadcast %40 : vector<1x128xf32> to vector<8x128xf32>
    %42 = arith.addf %39, %41 : vector<8x128xf32>
    %43 = vector.extract_strided_slice %42 {offsets = [0, 0], sizes = [8, 32], strides = [1, 1]} : vector<8x128xf32> to vector<8x32xf32>
    %44 = arith.negf %43 : vector<8x32xf32>
    %45 = math.exp %44 : vector<8x32xf32>
    %cst_28 = arith.constant 1.000000e+00 : f32
    %46 = vector.broadcast %cst_28 : f32 to vector<8x32xf32>
    %47 = arith.addf %46, %45 : vector<8x32xf32>
    %48 = arith.divf %46, %47 : vector<8x32xf32>
    %49 = vector.extract_strided_slice %42 {offsets = [0, 32], sizes = [8, 32], strides = [1, 1]} : vector<8x128xf32> to vector<8x32xf32>
    %50 = arith.negf %49 : vector<8x32xf32>
    %51 = math.exp %50 : vector<8x32xf32>
    %cst_29 = arith.constant 1.000000e+00 : f32
    %52 = vector.broadcast %cst_29 : f32 to vector<8x32xf32>
    %53 = arith.addf %52, %51 : vector<8x32xf32>
    %54 = arith.divf %52, %53 : vector<8x32xf32>
    %55 = vector.extract_strided_slice %42 {offsets = [0, 64], sizes = [8, 32], strides = [1, 1]} : vector<8x128xf32> to vector<8x32xf32>
    %56 = math.tanh %55 : vector<8x32xf32>
    %57 = vector.extract_strided_slice %42 {offsets = [0, 96], sizes = [8, 32], strides = [1, 1]} : vector<8x128xf32> to vector<8x32xf32>
    %58 = arith.negf %57 : vector<8x32xf32>
    %59 = math.exp %58 : vector<8x32xf32>
    %cst_30 = arith.constant 1.000000e+00 : f32
    %60 = vector.broadcast %cst_30 : f32 to vector<8x32xf32>
    %61 = arith.addf %60, %59 : vector<8x32xf32>
    %62 = arith.divf %60, %61 : vector<8x32xf32>
    %63 = arith.mulf %54, %2 : vector<8x32xf32>
    %64 = arith.mulf %48, %56 : vector<8x32xf32>
    %65 = arith.addf %63, %64 : vector<8x32xf32>
    %66 = math.tanh %65 : vector<8x32xf32>
    %67 = arith.mulf %62, %66 : vector<8x32xf32>
    %68 = tpu.concatenate %67, %65 in 1 : vector<8x32xf32>, vector<8x32xf32> -> vector<8x64xf32>
    %c0_31 = arith.constant 0 : index
    %c0_32 = arith.constant 0 : index
    %69 = vector.load %arg11[%c0_31, %c0_32] : memref<8x64xf32, #tpu.memory_space<vmem>>, vector<8x64xf32>
    tpu.vector_store %arg11[%c0_31, %c0_32], %68 {strides = array<i32>} : memref<8x64xf32, #tpu.memory_space<vmem>>, vector<8x64xf32>,
    return
  }
  func.func @transform_0(%arg0: i32) -> (i32, i32, i32) {
    %c0_i32 = arith.constant 0 : i32
    %c0_i32_0 = arith.constant 0 : i32
    %c0_i32_1 = arith.constant 0 : i32
    return %arg0, %c0_i32, %c0_i32_0 : i32, i32, i32
  }
  func.func @transform_1(%arg0: i32) -> (i32, i32) {
    %c0_i32 = arith.constant 0 : i32
    %c0_i32_0 = arith.constant 0 : i32
    return %arg0, %c0_i32 : i32, i32
  }
  func.func @transform_2(%arg0: i32) -> (i32, i32) {
    %c0_i32 = arith.constant 0 : i32
    %c0_i32_0 = arith.constant 0 : i32
    return %arg0, %c0_i32 : i32, i32
  }
  func.func @transform_3(%arg0: i32) -> (i32, i32) {
    %c0_i32 = arith.constant 0 : i32
    %c0_i32_0 = arith.constant 0 : i32
    return %arg0, %c0_i32 : i32, i32
  }
  func.func @transform_4(%arg0: i32) -> (i32, i32) {
    %c0_i32 = arith.constant 0 : i32
    %c0_i32_0 = arith.constant 0 : i32
    %c0_i32_1 = arith.constant 0 : i32
    return %c0_i32, %c0_i32_0 : i32, i32
  }
  func.func @transform_5(%arg0: i32) -> (i32, i32) {
    %c0_i32 = arith.constant 0 : i32
    %c0_i32_0 = arith.constant 0 : i32
    %c0_i32_1 = arith.constant 0 : i32
    return %c0_i32, %c0_i32_0 : i32, i32
  }
  func.func @transform_6(%arg0: i32) -> (i32, i32) {
    %c0_i32 = arith.constant 0 : i32
    %c0_i32_0 = arith.constant 0 : i32
    %c0_i32_1 = arith.constant 0 : i32
    return %c0_i32, %c0_i32_0 : i32, i32
  }
  func.func @transform_7(%arg0: i32) -> (i32, i32) {
    %c0_i32 = arith.constant 0 : i32
    %c0_i32_0 = arith.constant 0 : i32
    %c0_i32_1 = arith.constant 0 : i32
    return %c0_i32, %c0_i32_0 : i32, i32
  }
  func.func @transform_8(%arg0: i32) -> (i32, i32) {
    %c0_i32 = arith.constant 0 : i32
    %c0_i32_0 = arith.constant 0 : i32
    %c0_i32_1 = arith.constant 0 : i32
    return %c0_i32, %c0_i32_0 : i32, i32
  }
  func.func @transform_9(%arg0: i32) -> (i32, i32) {
    %c0_i32 = arith.constant 0 : i32
    %c0_i32_0 = arith.constant 0 : i32
    %c0_i32_1 = arith.constant 0 : i32
    return %c0_i32, %c0_i32_0 : i32, i32
  }
  func.func @transform_10(%arg0: i32) -> (i32, i32) {
    %c0_i32 = arith.constant 0 : i32
    %c0_i32_0 = arith.constant 0 : i32
    return %arg0, %c0_i32 : i32, i32
  }
  func.func @transform_11(%arg0: i32) -> (i32, i32) {
    %c0_i32 = arith.constant 0 : i32
    %c0_i32_0 = arith.constant 0 : i32
    return %arg0, %c0_i32 : i32, i32
  }
}

</mosaic_0001>

<bundles_post_ra>
// kernel: tpu_custom_call.1
= control target key start
LH: loop header
LB: loop body
LE: loop exit
PB: predicated region body
PF: predicated region fallthrough
CT: control target
= control target key end

     0   :  { %17 = vsyncpa [#allocation3], 0  ;;  %s1754_s0 = inlined_call_operand.hbm [shape: f32[8,8,32], index: 0, kind: input, shape index: {}]   ;;  %s1755_s1 = inlined_call_operand.hbm [shape: f32[8,32], index: 1, kind: input, shape index: {}]   ;;  %s1756_s2 = inlined_call_operand.hbm [shape: f32[8,32], index: 2, kind: input, shape index: {}]   ;;  %s1757_s3 = inlined_call_operand.hbm [shape: f32[8,16], index: 3, kind: input, shape index: {}]   ;;  %s1758_s4 = inlined_call_operand.hbm [shape: f32[32,32], index: 4, kind: input, shape index: {}]   ;;  %s1759_s5 = inlined_call_operand.hbm [shape: f32[32,32], index: 5, kind: input, shape index: {}]   ;;  %s1760_s6 = inlined_call_operand.vmem [shape: f32[1,32], index: 6, kind: input, shape index: {}]   ;;  %s1761_s7 = inlined_call_operand.vmem [shape: f32[1,32], index: 7, kind: input, shape index: {}]   ;;  %s1762_s8 = inlined_call_operand.hbm [shape: f32[80,128], index: 8, kind: input, shape index: {}]   ;;  %s1763_s9 = inlined_call_operand.vmem [shape: f32[1,128], index: 9, kind: input, shape index: {}]   ;;  %s1764_s10 = inlined_call_operand.hbm [shape: f32[8,64], index: 10, kind: output, shape index: {0}]   ;;  %s1765_s11 = inlined_call_operand.hbm [shape: f32[8,8], index: 11, kind: output, shape index: {1}]  }
   0x1   :  { %18 = vsyncpa [#allocation6], 0 }
   0x2   :  { %19 = vsyncpa [#allocation9], 0 }
   0x3   :  { %20 = vsyncpa [#allocation12], 0 }
   0x4   :  { %21 = vsyncpa [#allocation4], 0 }
   0x5   :  { %22 = vsyncpa [#allocation16], 0  ;;  %s1432_s17 = smov [#allocation5]   ;;  %s1433_s19 = smov [#allocation8]  }
   0x6   :  { %s41_s18 = sshll.u32 %s1432_s17, 4  ;;  %s61_s20 = sshll.u32 %s1433_s19, 4  ;;  %s42_s18 = int_to_ptr.vmem [resolvable:$true] %s41_s18  ;;  %s62_s20 = int_to_ptr.vmem [resolvable:$true] %s61_s20 }
   0x7   :  { %s1248_s21 = scalar_lea.vmem %s42_s18, 128  ;;  %p1253_p1 = scmp.lt.s32.totalorder %s42_s18, %s42_s18 }
   0x8   :  { %p1249_p0 = scmp.ne.s32.totalorder %s42_s18, %s1248_s21  ;;  %p1254_p2 = scmp.lt.s32.totalorder %s1248_s21, %s1248_s21 }
   0xa   :  { %p1255_p3 = por %p1254_p2, %p1253_p1 }
   0xc   :  { %p1256_p4 = pnand %p1255_p3, %p1249_p0 }
   0xe   :  { %1259 = shalt.err (!%p1256_p4)
}
   0xf   :  { %44 = dma.hbm_to_vmem [thread:$0]  %s1755_s1, 128, %s42_s18, [#allocation6]  }
  0x10   :  { %s1268_s24 = scalar_lea.vmem %s62_s20, 128  ;;  %p1273_p6 = scmp.lt.s32.totalorder %s62_s20, %s62_s20 }
  0x11   :  { %p1269_p5 = scmp.ne.s32.totalorder %s62_s20, %s1268_s24  ;;  %p1274_p7 = scmp.lt.s32.totalorder %s1268_s24, %s1268_s24 }
  0x13   :  { %p1275_p8 = por %p1274_p7, %p1273_p6 }
  0x15   :  { %p1276_p9 = pnand %p1275_p8, %p1269_p5 }
  0x17   :  { %1279 = shalt.err (!%p1276_p9)
}
  0x18   :  { %64 = dma.hbm_to_vmem [thread:$0]  %s1757_s3, 128, %s62_s20, [#allocation9]  }
  0x19   :  { %s1434_s27 = smov [#allocation11]   ;;  %s1435_s29 = smov [#allocation2]  }
  0x1a   :  { %s82_s28 = sshll.u32 %s1434_s27, 4  ;;  %s28_s30 = sshll.u32 %s1435_s29, 4  ;;  %s83_s28 = int_to_ptr.vmem [resolvable:$true] %s82_s28  ;;  %s29_s30 = int_to_ptr.vmem [resolvable:$true] %s28_s30 }
  0x1b   :  { %s1288_s12 = scalar_lea.vmem %s83_s28, 512  ;;  %p1293_p11 = scmp.lt.s32.totalorder %s83_s28, %s83_s28 }
  0x1c   :  { %p1289_p10 = scmp.ne.s32.totalorder %s83_s28, %s1288_s12  ;;  %p1294_p12 = scmp.lt.s32.totalorder %s1288_s12, %s1288_s12 }
  0x1e   :  { %p1295_p13 = por %p1294_p12, %p1293_p11 }
  0x20   :  { %p1296_p0 = pnand %p1295_p13, %p1289_p10 }
  0x22   :  { %1299 = shalt.err (!%p1296_p0)
}
  0x23   :  { %s1436_s1 = smov 128   ;;  %s1437_s13 = smov 8  }
  0x24   :  { %88 = dma.hbm_to_vmem [thread:$0]  %s1759_s5, 512, %s83_s28, [#allocation12], %s1436_s1, %s1436_s1, %s1437_s13  }
  0x25   :  { %s1308_s15 = scalar_lea.vmem %s29_s30, 1024  ;;  %p1313_p2 = scmp.lt.s32.totalorder %s29_s30, %s29_s30 }
  0x26   :  { %p1309_p1 = scmp.ne.s32.totalorder %s29_s30, %s1308_s15  ;;  %p1314_p3 = scmp.lt.s32.totalorder %s1308_s15, %s1308_s15 }
  0x28   :  { %p1315_p4 = por %p1314_p3, %p1313_p2 }
  0x2a   :  { %p1316_p5 = pnand %p1315_p4, %p1309_p1 }
  0x2c   :  { %1319 = shalt.err (!%p1316_p5)
}
  0x2d   :  { %34 = dma.hbm_to_vmem [thread:$0]  %s1754_s0, 1024, %s29_s30, [#allocation3], %s1436_s1, %s1436_s1, %s1437_s13  }
  0x2e   :  { %s1438_s18 = smov [#allocation7]   ;;  %s1439_s20 = smov [#allocation10]  }
  0x2f   :  { %s51_s19 = sshll.u32 %s1438_s18, 4  ;;  %s70_s21 = sshll.u32 %s1439_s20, 4  ;;  %s52_s19 = int_to_ptr.vmem [resolvable:$true] %s51_s19  ;;  %s71_s21 = int_to_ptr.vmem [resolvable:$true] %s70_s21 }
  0x30   :  { %s1328_s5 = scalar_lea.vmem %s52_s19, 128  ;;  %p1333_p7 = scmp.lt.s32.totalorder %s52_s19, %s52_s19 }
  0x31   :  { %p1329_p6 = scmp.ne.s32.totalorder %s52_s19, %s1328_s5  ;;  %p1334_p8 = scmp.lt.s32.totalorder %s1328_s5, %s1328_s5 }
  0x33   :  { %p1335_p9 = por %p1334_p8, %p1333_p7 }
  0x35   :  { %p1336_p10 = pnand %p1335_p9, %p1329_p6 }
  0x37   :  { %1339 = shalt.err (!%p1336_p10)
}
  0x38   :  { %54 = dma.hbm_to_vmem [thread:$0]  %s1756_s2, 128, %s52_s19, [#allocation6]  }
  0x39   :  { %s1348_s24 = scalar_lea.vmem %s71_s21, 512  ;;  %p1353_p12 = scmp.lt.s32.totalorder %s71_s21, %s71_s21 }
  0x3a   :  { %p1349_p11 = scmp.ne.s32.totalorder %s71_s21, %s1348_s24  ;;  %p1354_p13 = scmp.lt.s32.totalorder %s1348_s24, %s1348_s24 }
  0x3c   :  { %p1355_p0 = por %p1354_p13, %p1353_p12 }
  0x3e   :  { %p1356_p1 = pnand %p1355_p0, %p1349_p11 }
  0x40   :  { %1359 = shalt.err (!%p1356_p1)
}
  0x41   :  { %76 = dma.hbm_to_vmem [thread:$0]  %s1758_s4, 512, %s71_s21, [#allocation9], %s1436_s1, %s1436_s1, %s1437_s13  }
  0x42   :  { %s1440_s26 = smov [#allocation13]  }
  0x43   :  { %s98_s27 = sshll.u32 %s1440_s26, 4  ;;  %s99_s27 = int_to_ptr.vmem [resolvable:$true] %s98_s27 }
  0x44   :  { %s1368_s28 = scalar_lea.vmem %s99_s27, 1280  ;;  %p1373_p3 = scmp.lt.s32.totalorder %s99_s27, %s99_s27 }
  0x45   :  { %p1369_p2 = scmp.ne.s32.totalorder %s99_s27, %s1368_s28  ;;  %p1374_p4 = scmp.lt.s32.totalorder %s1368_s28, %s1368_s28 }
  0x47   :  { %p1375_p5 = por %p1374_p4, %p1373_p3 }
  0x49   :  { %p1376_p6 = pnand %p1375_p5, %p1369_p2 }
  0x4b   :  { %1379 = shalt.err (!%p1376_p6)
}
  0x4c   :  { %104 = dma.hbm_to_vmem [thread:$0]  %s1762_s8, 1280, %s99_s27, [#allocation12], %s1436_s1, %s1436_s1, %s1437_s13  }
  0x4d   :  { %1420 = dma.done.wait [#allocation3], 1024  }
  0x4e   :  { %1421 = vsyncadd [#allocation3], 4294966272 }
  0x4f   :  { %1422 = dma.done.wait [#allocation6], 256  }
  0x50   :  { %1423 = vsyncadd [#allocation6], 4294967040 }
  0x51   :  { %1424 = dma.done.wait [#allocation9], 640  }
  0x52   :  { %1425 = vsyncadd [#allocation9], 4294966656 }
  0x53   :  { %1426 = dma.done.wait [#allocation12], 1792  }
  0x54   :  { %1427 = vsyncadd [#allocation12], 4294965504  ;;  %v1441_v0 = vmov 0.0   ;;  %vm1442_vm0 = vmmov 0   ;;  %vm143_vm1 = vcmask 261120   ;;  %v142_v1 = vld [vmem:[#allocation10 + $0x18] sm:$0xff]  ;;  %v362_v24 = vlaneseq }
  0x55   :  { %1155 = vmatprep.subr.mxu0 %v1441_v0  ;;  %1175 = vmatprep.mubr.msk.f32.mxu0 %vm1442_vm0, %v1441_v0  ;;  %v141_v2 = vld [vmem:[#allocation10 + $0x10] sm:$0xff]  ;;  %v1546_v3 = vld [vmem:[#allocation2] sm:$0xff]  ;;  %v139_v5 = vld [vmem:[#allocation10] sm:$0xff]  ;;  %v1443_v22 = vmov 1966171168   ;;  %vm544_vm2 = vcmask 1041409  }
  0x56   :  { %1124 = vmatprep.subr.mxu1 %v142_v1  ;;  %v140_v4 = vld [vmem:[#allocation10 + $0x8] sm:$0xff]  ;;  %1132 = vmatprep.mubr.msk.f32.mxu1 %vm143_vm1, %v1546_v3  ;;  %v1550_v6 = vld [vmem:[#allocation2 + $0x8] sm:$0xff]  ;;  %v276_v7 = vld [vmem:[#allocation11 + $0x18] sm:$0xff]  ;;  %v360_v23 = vunpack.c.l.s4 %v1443_v22  ;;  %v1589_v28 = vshrl.u32 %v362_v24, 7  ;;  %vm546_vm3 = vcmask 1042434   ;;  %vm548_vm4 = vcmask 1043459  }
  0x57   :  { %1125 = vmatpush3.msra.mxu1 %v142_v1  ;;  %v1552_v8 = vld [vmem:[#allocation2 + $0x10] sm:$0xff]  ;;  %v275_v9 = vld [vmem:[#allocation11 + $0x10] sm:$0xff]  ;;  %v1559_v10 = vld [vmem:[#allocation2 + $0x18] sm:$0xff]  ;;  %vm550_vm5 = vcmask 1044484   ;;  %vm552_vm6 = vcmask 1045509   ;;  %vm554_vm7 = vcmask 1046534  }
  0x58   :  { %1126 = vmatprep.subr.mxu1 %v141_v2  ;;  %v1562_v11 = vld [vmem:[#allocation2 + $0x20] sm:$0xff]  ;;  %v273_v13 = vld [vmem:[#allocation11] sm:$0xff]  ;;  %v1569_v14 = vld [vmem:[#allocation2 + $0x28] sm:$0xff]  ;;  %v361_v27 = vunpack.c.0.s8 %v360_v23  ;;  %v1596_v38 = vsub.s32 0, %v1589_v28  ;;  %vm556_vm8 = vcmask 1047559   ;;  %vm559_vm9 = vcmask 64512  }
  0x59   :  { %1127 = vmatpush3.msra.mxu1 %v141_v2  ;;  %v274_v12 = vld [vmem:[#allocation11 + $0x8] sm:$0xff]  ;;  %v1571_v15 = vld [vmem:[#allocation2 + $0x30] sm:$0xff]  ;;  %v1578_v16 = vld [vmem:[#allocation2 + $0x38] sm:$0xff]  ;;  %s1446_s12 = smov 48   ;;  %vm922_vm10 = vcmask 392192   ;;  %vm941_vm11 = vcmask 654336  }
  0x5a   :  { %1128 = vmatprep.subr.mxu1 %v140_v4  ;;  %v1584_v17 = vld [vmem:[#allocation5] sm:$0xff]  ;;  %v364_v32 = vsub.s32 %v361_v27, %v1589_v28  ;;  %s1447_s14 = smov 64  }
  0x5b   :  { %1129 = vmatpush3.msra.mxu1 %v140_v4  ;;  %v1090_v31 = vld [vmem:[%s1760_s6] ss:$0 sm:$0xff] }
  0x5c   :  { %1130 = vmatprep.subr.mxu1 %v139_v5  ;;  %v1092_v4 = vld [vmem:[%s1761_s7] ss:$0 sm:$0xff]  ;;  %s1445_s7 = smov 32  }
  0x5d   :  { %1131 = vmatpush3.msra.mxu1 %v139_v5 }
  0x5e   :  { %1133 = vmatmul.mubr.msk.f32.vlgmr.msra.gmra.mxu1 %vm143_vm1, %v1550_v6  ;;  %1144 = vmatprep.subr.mxu1 %v1441_v0 }
  0x5f   :  { %1145 = vmatpush3.msra.mxu1 %v276_v7  ;;  %1135 = vmatprep.mubr.msk.f32.mxu1 %vm143_vm1, %v1552_v8 }
  0x60   :  { %1146 = vmatprep.subr.mxu1 %v1441_v0 }
  0x61   :  { %1147 = vmatpush3.msra.mxu1 %v275_v9 }
  0x62   :  { %1136 = vmatmul.mubr.msk.f32.gmra.mxu1 %vm143_vm1, %v1559_v10  ;;  %1148 = vmatprep.subr.mxu1 %v1441_v0 }
  0x63   :  { %1138 = vmatprep.mubr.msk.f32.mxu1 %vm143_vm1, %v1562_v11  ;;  %1149 = vmatpush3.msra.mxu1 %v274_v12 }
  0x64   :  { %1150 = vmatprep.subr.mxu1 %v1441_v0 }
  0x65   :  { %1151 = vmatpush3.msra.mxu1 %v273_v13 }
  0x66   :  { %1139 = vmatmul.mubr.msk.f32.gmra.mxu1 %vm143_vm1, %v1569_v14 }
  0x67   :  { %1141 = vmatprep.mubr.msk.f32.mxu1 %vm143_vm1, %v1571_v15 }
  0x6a   :  { %1142 = vmatmul.mubr.msk.f32.gmra.mxu1 %vm143_vm1, %v1578_v16 }
  0x6b   :  { %1152 = vmatprep.mubr.msk.f32.mxu1 %vm1442_vm0, %v1441_v0 }
  0x6e   :  { %1153 = vmatmul.mubr.msk.f32.vlgmr.msra.gmra.mxu1 %vm143_vm1, %v1584_v17 }
 0x11e   :  { %v1134_v18 = vpop.f32.mrf.mxu1 }
 0x120   :  { %v234_v19 = vpop.f32.mrf.mxu1 }
 0x122   :  { %v1137_v20 = vpop.f32.mrf.mxu1 }
 0x124   :  { %v244_v21 = vpop.f32.mrf.mxu1 }
 0x126   :  { %v1140_v25 = vpop.f32.mrf.mxu1 }
 0x128   :  { %v254_v26 = vpop.f32.mrf.mxu1 }
 0x12a   :  { %v1143_v29 = vpop.f32.mrf.mxu1 }
 0x12c   :  { %v264_v30 = vpop.f32.mrf.mxu1 }
 0x12e   :  { %v353_v33 = vpop.f32.mrf.mxu1 }
 0x12f   :  { %v354_v34 = vadd.f32 %v1090_v31, %v353_v33 }
 0x130   :  { %v1154_v35 = vpop.f32.mrf.mxu1 }
 0x131   :  { %v358_v36 = vcombine.high %v354_v34, %v354_v34  ;;  %v365_v37 = vrot.slane %v354_v34, %v364_v32 }
 0x133   :  { %v372_v39 = vrot.slane %v358_v36, %v364_v32  ;;  %v373_v40 = vcombine.high %v365_v37, %v365_v37  ;;  %v381_v41 = vrot.slane %v365_v37, %v364_v32 }
 0x135   :  { %v374_v42 = vcombine.high %v372_v39, %v372_v39  ;;  %v388_v43 = vrot.slane %v372_v39, %v364_v32  ;;  %v395_v44 = vrot.slane %v373_v40, %v364_v32  ;;  %v403_v45 = vcombine.high %v381_v41, %v381_v41 }
 0x136   :  { %v410_v46 = vrot.slane %v381_v41, %v1596_v38  ;;  %v511_v40 = vand.u32 127, %v362_v24 }
 0x137   :  { %v402_v47 = vrot.slane %v374_v42, %v364_v32  ;;  %v404_v48 = vcombine.high %v388_v43, %v388_v43  ;;  %v405_v49 = vcombine.high %v395_v44, %v395_v44  ;;  %v414_v50 = vrot.slane %v395_v44, %v1596_v38 }
 0x138   :  { %v418_v51 = vrot.slane %v403_v45, %v1596_v38  ;;  %v426_v52 = vrot.slane %v388_v43, %v1596_v38  ;;  %v447_v53 = vadd.f32 %v410_v46, %v234_v19  ;;  %v1619_v42 = vsub.s32 %v511_v40, %v1589_v28 }
 0x139   :  { %v406_v54 = vcombine.high %v402_v47, %v402_v47  ;;  %v422_v55 = vrot.slane %v405_v49, %v1596_v38  ;;  %v430_v56 = vrot.slane %v402_v47, %v1596_v38  ;;  %v434_v57 = vrot.slane %v404_v48, %v1596_v38 }
 0x13a   :  { %v448_v58 = vadd.f32 %v1134_v18, %v414_v50  ;;  %v449_v59 = vadd.f32 %v418_v51, %v244_v21  ;;  %1198 = vtanh.f32 %v447_v53  ;;  %v451_v61 = vadd.f32 %v426_v52, %v254_v26 }
 0x13b   :  { %v450_v60 = vadd.f32 %v1137_v20, %v422_v55  ;;  %v438_v62 = vrot.slane %v406_v54, %v1596_v38  ;;  %v452_v63 = vadd.f32 %v1140_v25, %v430_v56  ;;  %v453_v1 = vadd.f32 %v434_v57, %v264_v30 }
 0x13c   :  { %1200 = vtanh.f32 %v448_v58 }
 0x13d   :  { %1202 = vtanh.f32 %v449_v59  ;;  %v454_v2 = vadd.f32 %v1143_v29, %v438_v62 }
 0x13e   :  { %1204 = vtanh.f32 %v450_v60 }
 0x13f   :  { %1206 = vtanh.f32 %v451_v61 }
 0x140   :  { %1208 = vtanh.f32 %v452_v63 }
 0x141   :  { %1210 = vtanh.f32 %v453_v1 }
 0x142   :  { %1212 = vtanh.f32 %v454_v2  ;;  %v1444_v2 = vmov 0  }
 0x143   :  { %1197 = vset.pattern.permute.xlu0 %v1444_v2  ;;  %1196 = vset.pattern.permute.xlu1 %v1444_v2 }
 0x147   :  { %v1199_v5 = vpop.eup %1198 }
 0x148   :  { %v470_v7 = vmul.f32 %v1199_v5, %v1092_v4  ;;  %v574_v5 = vsub.s32 2, %v1589_v28 }
 0x149   :  { %v1201_v9 = vpop.eup %1200 }
 0x14a   :  { %v1203_v12 = vpop.eup %1202  ;;  %v478_v13 = vsel %vm143_vm1, %v470_v7, 0.0  ;;  %v471_v18 = vmul.f32 %v1201_v9, %v1092_v4  ;;  %v578_v7 = vsub.s32 3, %v1589_v28 }
 0x14b   :  { %v1205_v19 = vpop.eup %1204  ;;  %479 = vadd.xlane.f32.xlu0 %v478_v13  ;;  %v472_v20 = vmul.f32 %v1203_v12, %v1092_v4 }
 0x14c   :  { %v1207_v21 = vpop.eup %1206  ;;  %v473_v23 = vmul.f32 %v1205_v19, %v1092_v4  ;;  %v481_v26 = vsel %vm143_vm1, %v471_v18, 0.0  ;;  %v582_v19 = vsub.s32 4, %v1589_v28 }
 0x14d   :  { %v484_v22 = vsel %vm143_vm1, %v472_v20, 0.0  ;;  %v1209_v25 = vpop.eup %1208  ;;  %v474_v27 = vmul.f32 %v1207_v21, %v1092_v4 }
 0x14e   :  { %485 = vadd.xlane.f32.xlu1 %v484_v22  ;;  %v1211_v29 = vpop.eup %1210  ;;  %v487_v30 = vsel %vm143_vm1, %v473_v23, 0.0  ;;  %v475_v31 = vmul.f32 %v1209_v25, %v1092_v4 }
 0x14f   :  { %482 = vadd.xlane.f32.xlu0 %v481_v26  ;;  %v1213_v32 = vpop.eup %1212  ;;  %v490_v33 = vsel %vm143_vm1, %v474_v27, 0.0  ;;  %v476_v34 = vmul.f32 %v1211_v29, %v1092_v4  ;;  %v586_v27 = vsub.s32 5, %v1589_v28 }
 0x150   :  { %v493_v35 = vsel %vm143_vm1, %v475_v31, 0.0  ;;  %v477_v36 = vmul.f32 %v1213_v32, %v1092_v4  ;;  %v570_v4 = vsub.s32 1, %v1589_v28  ;;  %v590_v32 = vsub.s32 6, %v1589_v28 }
 0x151   :  { %v496_v37 = vsel %vm143_vm1, %v476_v34, 0.0 }
 0x152   :  { %488 = vadd.xlane.f32.xlu1 %v487_v30  ;;  %v499_v39 = vsel %vm143_vm1, %v477_v36, 0.0  ;;  %v594_v36 = vsub.s32 7, %v1589_v28  ;;  %v930_v28 = vld [vmem:[#allocation13 + $0x30] sm:$0xff] }
 0x153   :  { %491 = vadd.xlane.f32.xlu0 %v490_v33 }
 0x156   :  { %494 = vadd.xlane.f32.xlu1 %v493_v35 }
 0x157   :  { %497 = vadd.xlane.f32.xlu0 %v496_v37 }
 0x15a   :  { %500 = vadd.xlane.f32.xlu1 %v499_v39 }
 0x1d4   :  { %v480_v41 = vpop.xlane.xlu0 %479 }
 0x1d5   :  { %v515_v45 = vrot.slane %v480_v41, %v1619_v42 }
 0x1d7   :  { %v486_v43 = vpop.xlane.xlu1 %485 }
 0x1d8   :  { %v483_v44 = vpop.xlane.xlu0 %482  ;;  %v523_v47 = vrot.slane %v486_v43, %v1619_v42 }
 0x1d9   :  { %v519_v46 = vrot.slane %v483_v44, %v1619_v42 }
 0x1db   :  { %v545_v48 = vsel %vm544_vm2, %v519_v46, %v515_v45  ;;  %v489_v49 = vpop.xlane.xlu1 %488 }
 0x1dc   :  { %v547_v24 = vsel %vm546_vm3, %v523_v47, %v545_v48  ;;  %v527_v50 = vrot.slane %v489_v49, %v1619_v42  ;;  %v492_v51 = vpop.xlane.xlu0 %491 }
 0x1dd   :  { %v531_v52 = vrot.slane %v492_v51, %v1619_v42 }
 0x1de   :  { %v549_v53 = vsel %vm548_vm4, %v527_v50, %v547_v24 }
 0x1df   :  { %v551_v54 = vsel %vm550_vm5, %v531_v52, %v549_v53  ;;  %v495_v55 = vpop.xlane.xlu1 %494 }
 0x1e0   :  { %v535_v56 = vrot.slane %v495_v55, %v1619_v42  ;;  %v498_v57 = vpop.xlane.xlu0 %497 }
 0x1e1   :  { %v539_v58 = vrot.slane %v498_v57, %v1619_v42 }
 0x1e2   :  { %v553_v59 = vsel %vm552_vm6, %v535_v56, %v551_v54 }
 0x1e3   :  { %v501_v60 = vpop.xlane.xlu1 %500  ;;  %v555_v61 = vsel %vm554_vm7, %v539_v58, %v553_v59 }
 0x1e4   :  { %v543_v62 = vrot.slane %v501_v60, %v1619_v42 }
 0x1e6   :  { %v557_v63 = vsel %vm556_vm8, %v543_v62, %v555_v61 }
 0x1e7   :  { %v560_v1 = vsel %vm559_vm9, %v557_v63, -inf }
 0x1e8   :  { %561 = vmax.xlane.f32.xlu0 %v560_v1 }
 0x271   :  { %v562_v9 = vpop.xlane.xlu0 %561 }
 0x272   :  { %v567_v12 = vrot.slane %v562_v9, %v1596_v38  ;;  %v571_v13 = vrot.slane %v562_v9, %v570_v4  ;;  %v575_v18 = vrot.slane %v562_v9, %v574_v5  ;;  %v579_v20 = vrot.slane %v562_v9, %v578_v7 }
 0x273   :  { %v583_v29 = vrot.slane %v562_v9, %v582_v19  ;;  %v587_v33 = vrot.slane %v562_v9, %v586_v27  ;;  %v591_v37 = vrot.slane %v562_v9, %v590_v32 }
 0x274   :  { %v604_v21 = vsub.f32 %v480_v41, %v567_v12  ;;  %v605_v22 = vsub.f32 %v483_v44, %v571_v13  ;;  %v606_v23 = vsub.f32 %v486_v43, %v575_v18  ;;  %v607_v30 = vsub.f32 %v489_v49, %v579_v20 }
 0x275   :  { %v608_v34 = vsub.f32 %v492_v51, %v583_v29  ;;  %v609_v39 = vsub.f32 %v495_v55, %v587_v33  ;;  %v595_v41 = vrot.slane %v562_v9, %v594_v36  ;;  %v610_v43 = vsub.f32 %v498_v57, %v591_v37  ;;  %v138_v33 = vld [vmem:[#allocation8] sm:$0xff] }
 0x276   :  { %v612_v25 = vmul.f32 1.442695, %v604_v21  ;;  %v614_v26 = vmul.f32 1.442695, %v605_v22  ;;  %v616_v31 = vmul.f32 1.442695, %v606_v23 }
 0x277   :  { %v618_v35 = vmul.f32 1.442695, %v607_v30  ;;  %v620_v40 = vmul.f32 1.442695, %v608_v34  ;;  %v622_v44 = vmul.f32 1.442695, %v609_v39  ;;  %v611_v47 = vsub.f32 %v501_v60, %v595_v41 }
 0x278   :  { %1214 = vpow2.f32 %v612_v25  ;;  %v624_v48 = vmul.f32 1.442695, %v610_v43 }
 0x279   :  { %1216 = vpow2.f32 %v614_v26  ;;  %v626_v24 = vmul.f32 1.442695, %v611_v47 }
 0x27a   :  { %1218 = vpow2.f32 %v616_v31 }
 0x27b   :  { %1220 = vpow2.f32 %v618_v35 }
 0x27c   :  { %1222 = vpow2.f32 %v620_v40 }
 0x27d   :  { %1224 = vpow2.f32 %v622_v44 }
 0x27e   :  { %1226 = vpow2.f32 %v624_v48 }
 0x27f   :  { %1228 = vpow2.f32 %v626_v24 }
 0x285   :  { %v1215_v45 = vpop.eup %1214 }
 0x286   :  { %v1217_v46 = vpop.eup %1216  ;;  %637 = vperm.xlu1 %1196, %v1215_v45  }
 0x287   :  { %640 = vperm.xlu0 %1197, %v1217_v46   ;;  %v1219_v49 = vpop.eup %1218 }
 0x288   :  { %v1221_v50 = vpop.eup %1220 }
 0x289   :  { %v1223_v51 = vpop.eup %1222 }
 0x28a   :  { %643 = vperm.xlu1 %1196, %v1219_v49   ;;  %v1225_v52 = vpop.eup %1224 }
 0x28b   :  { %v1227_v53 = vpop.eup %1226 }
 0x28c   :  { %v1229_v54 = vpop.eup %1228 }
 0x28e   :  { %646 = vperm.xlu1 %1196, %v1221_v50  }
 0x292   :  { %649 = vperm.xlu1 %1196, %v1223_v51  }
 0x296   :  { %652 = vperm.xlu1 %1196, %v1225_v52  }
 0x29a   :  { %655 = vperm.xlu1 %1196, %v1227_v53  }
 0x29e   :  { %658 = vperm.xlu1 %1196, %v1229_v54  }
 0x301   :  { %v638_v55 = vpop.permute.xlu1 %637 }
 0x302   :  { %v641_v59 = vpop.permute.xlu0 %640  ;;  %v663_v62 = vrot.slane %v638_v55, %v1619_v42 }
 0x303   :  { %v667_v61 = vrot.slane %v641_v59, %v1619_v42 }
 0x305   :  { %v644_v56 = vpop.permute.xlu1 %643  ;;  %v692_v12 = vsel %vm544_vm2, %v667_v61, %v663_v62 }
 0x306   :  { %v671_v63 = vrot.slane %v644_v56, %v1619_v42 }
 0x308   :  { %v693_v18 = vsel %vm546_vm3, %v671_v63, %v692_v12 }
 0x309   :  { %v647_v57 = vpop.permute.xlu1 %646 }
 0x30a   :  { %v675_v1 = vrot.slane %v647_v57, %v1619_v42 }
 0x30c   :  { %v694_v21 = vsel %vm548_vm4, %v675_v1, %v693_v18 }
 0x30d   :  { %v650_v58 = vpop.permute.xlu1 %649 }
 0x30e   :  { %v679_v2 = vrot.slane %v650_v58, %v1619_v42 }
 0x310   :  { %v695_v22 = vsel %vm550_vm5, %v679_v2, %v694_v21 }
 0x311   :  { %v653_v60 = vpop.permute.xlu1 %652 }
 0x312   :  { %v683_v13 = vrot.slane %v653_v60, %v1619_v42 }
 0x314   :  { %v696_v25 = vsel %vm552_vm6, %v683_v13, %v695_v22 }
 0x315   :  { %v656_v9 = vpop.permute.xlu1 %655 }
 0x316   :  { %v687_v20 = vrot.slane %v656_v9, %v1619_v42 }
 0x318   :  { %v697_v29 = vsel %vm554_vm7, %v687_v20, %v696_v25 }
 0x319   :  { %v659_v23 = vpop.permute.xlu1 %658 }
 0x31a   :  { %v691_v26 = vrot.slane %v659_v23, %v1619_v42 }
 0x31c   :  { %v698_v30 = vsel %vm556_vm8, %v691_v26, %v697_v29 }
 0x31d   :  { %v700_v31 = vsel %vm559_vm9, %v698_v30, 0.0 }
 0x31e   :  { %701 = vadd.xlane.f32.xlu1 %v700_v31 }
 0x32f   :  { %915 = vrot.lane.b32.xlu1 %v138_v33, %s1445_s7 }
 0x3a7   :  { %v702_v34 = vpop.xlane.xlu1 %701 }
 0x3a8   :  { %1230 = vrcp.f32 %v702_v34 }
 0x3b5   :  { %v1231_v35 = vpop.eup %1230 }
 0x3b6   :  { %v708_v37 = vrot.slane %v1231_v35, %v1596_v38  ;;  %v712_v40 = vrot.slane %v1231_v35, %v570_v4  ;;  %v716_v43 = vrot.slane %v1231_v35, %v574_v5  ;;  %v720_v47 = vrot.slane %v1231_v35, %v578_v7 }
 0x3b7   :  { %v724_v24 = vrot.slane %v1231_v35, %v582_v19  ;;  %v728_v4 = vrot.slane %v1231_v35, %v586_v27  ;;  %v732_v5 = vrot.slane %v1231_v35, %v590_v32  ;;  %v736_v7 = vrot.slane %v1231_v35, %v594_v36  ;;  %v932_v19 = vld [vmem:[#allocation13 + $0x40] sm:$0xff]  ;;  %v931_v27 = vld [vmem:[#allocation13 + $0x38] sm:$0xff]  ;;  %v929_v32 = vld [vmem:[#allocation13 + $0x28] sm:$0xff] }
 0x3b8   :  { %v745_v39 = vmul.f32 %v1215_v45, %v708_v37  ;;  %v746_v41 = vmul.f32 %v1217_v46, %v712_v40  ;;  %v747_v44 = vmul.f32 %v1219_v49, %v716_v43  ;;  %v748_v48 = vmul.f32 %v1221_v50, %v720_v47  ;;  %v933_v50 = vld [vmem:[#allocation13 + $0x48] sm:$0xff]  ;;  %v928_v36 = vld [vmem:[#allocation13 + $0x20] sm:$0xff] }
 0x3b9   :  { %v749_v38 = vmul.f32 %v1223_v51, %v724_v24  ;;  %v750_v45 = vmul.f32 %v1225_v52, %v728_v4  ;;  %v751_v46 = vmul.f32 %v1227_v53, %v732_v5  ;;  %v752_v49 = vmul.f32 %v1229_v54, %v736_v7  ;;  %1156 = vmatpush3.msra.mxu0 %v933_v50  ;;  %v927_v51 = vld [vmem:[#allocation13 + $0x18] sm:$0xff]  ;;  %v925_v52 = vld [vmem:[#allocation13 + $0x8] sm:$0xff]  ;;  %v924_v53 = vld [vmem:[#allocation13] sm:$0xff] }
 0x3ba   :  { %762 = vperm.xlu0 %1197, %v745_v39   ;;  %1157 = vmatprep.subr.mxu0 %v1441_v0 }
 0x3bb   :  { %1158 = vmatpush3.msra.mxu0 %v932_v19 }
 0x3bc   :  { %1159 = vmatprep.subr.mxu0 %v1441_v0 }
 0x3bd   :  { %1160 = vmatpush3.msra.mxu0 %v931_v27 }
 0x3be   :  { %765 = vperm.xlu0 %1197, %v746_v41   ;;  %1161 = vmatprep.subr.mxu0 %v1441_v0 }
 0x3bf   :  { %1162 = vmatpush3.msra.mxu0 %v930_v28 }
 0x3c0   :  { %1163 = vmatprep.subr.mxu0 %v1441_v0 }
 0x3c1   :  { %1164 = vmatpush3.msra.mxu0 %v929_v32 }
 0x3c2   :  { %768 = vperm.xlu0 %1197, %v747_v44   ;;  %1165 = vmatprep.subr.mxu0 %v1441_v0 }
 0x3c3   :  { %1166 = vmatpush3.msra.mxu0 %v928_v36 }
 0x3c4   :  { %1167 = vmatprep.subr.mxu0 %v1441_v0 }
 0x3c5   :  { %1168 = vmatpush3.msra.mxu0 %v927_v51 }
 0x3c6   :  { %771 = vperm.xlu0 %1197, %v748_v48   ;;  %1169 = vmatprep.subr.mxu0 %v1441_v0 }
 0x3ca   :  { %774 = vperm.xlu0 %1197, %v749_v38  }
 0x3ce   :  { %777 = vperm.xlu0 %1197, %v750_v45  }
 0x3d2   :  { %780 = vperm.xlu0 %1197, %v751_v46  }
 0x3d6   :  { %783 = vperm.xlu0 %1197, %v752_v49  }
 0x3da   :  { %918 = vrot.lane.b32.xlu0 %v1584_v17, %s1446_s12  ;;  %v926_v17 = vld [vmem:[#allocation13 + $0x10] sm:$0xff] }
 0x3db   :  { %1170 = vmatpush3.msra.mxu0 %v926_v17 }
 0x3dc   :  { %1171 = vmatprep.subr.mxu0 %v1441_v0 }
 0x3dd   :  { %1172 = vmatpush3.msra.mxu0 %v925_v52 }
 0x3de   :  { %1173 = vmatprep.subr.mxu0 %v1441_v0 }
 0x3df   :  { %1174 = vmatpush3.msra.mxu0 %v924_v53 }
 0x435   :  { %v763_v54 = vpop.permute.xlu0 %762 }
 0x436   :  { %v834_v57 = vmul.f32 %v763_v54, %v1546_v3  ;;  %v788_v29 = vrot.slane %v763_v54, %v1619_v42 }
 0x438   :  { %v842_v61 = vsel %vm143_vm1, %v834_v57, 0.0 }
 0x439   :  { %v766_v55 = vpop.permute.xlu0 %765  ;;  %v843_v2 = vrot.slane %v842_v61, 4 }
 0x43a   :  { %v835_v56 = vmul.f32 %v766_v55, %v1550_v6  ;;  %v792_v26 = vrot.slane %v766_v55, %v1619_v42 }
 0x43c   :  { %v849_v60 = vsel %vm143_vm1, %v835_v56, 0.0  ;;  %v817_v44 = vsel %vm544_vm2, %v792_v26, %v788_v29 }
 0x43d   :  { %v769_v58 = vpop.permute.xlu0 %768  ;;  %v850_v0 = vrot.slane %v849_v60, 4 }
 0x43e   :  { %v836_v59 = vmul.f32 %v769_v58, %v1552_v8  ;;  %v844_v8 = vadd.f32 %v843_v2, %v842_v61  ;;  %v796_v31 = vrot.slane %v769_v58, %v1619_v42 }
 0x43f   :  { %v851_v18 = vadd.f32 %v850_v0, %v849_v60 }
 0x440   :  { %v856_v62 = vsel %vm143_vm1, %v836_v59, 0.0  ;;  %v845_v34 = vrot.slane %v844_v8, 2  ;;  %v818_v38 = vsel %vm546_vm3, %v796_v31, %v817_v44  ;;  %v137_v44 = vld [vmem:[#allocation7] sm:$0xff] }
 0x441   :  { %v772_v63 = vpop.permute.xlu0 %771  ;;  %v857_v9 = vrot.slane %v856_v62, 4  ;;  %v852_v30 = vrot.slane %v851_v18, 2 }
 0x442   :  { %v837_v1 = vmul.f32 %v772_v63, %v1559_v10  ;;  %v800_v35 = vrot.slane %v772_v63, %v1619_v42  ;;  %v846_v5 = vadd.f32 %v845_v34, %v844_v8 }
 0x443   :  { %v858_v20 = vadd.f32 %v857_v9, %v856_v62  ;;  %v853_v24 = vadd.f32 %v852_v30, %v851_v18  ;;  %v916_v30 = vpop.permute.xlu1 %915 }
 0x444   :  { %v863_v12 = vsel %vm143_vm1, %v837_v1, 0.0  ;;  %v819_v7 = vsel %vm548_vm4, %v800_v35, %v818_v38  ;;  %v847_v59 = vrot.slane %v846_v5, 1 }
 0x445   :  { %v864_v6 = vrot.slane %v863_v12, 4  ;;  %v775_v13 = vpop.permute.xlu0 %774  ;;  %v854_v52 = vrot.slane %v853_v24, 1 }
 0x446   :  { %v838_v3 = vmul.f32 %v775_v13, %v1562_v11  ;;  %v859_v11 = vrot.slane %v858_v20, 2  ;;  %v804_v40 = vrot.slane %v775_v13, %v1619_v42  ;;  %v848_v9 = vadd.f32 %v847_v59, %v846_v5 }
 0x447   :  { %v865_v22 = vadd.f32 %v864_v6, %v863_v12 }
 0x448   :  { %v870_v21 = vsel %vm143_vm1, %v838_v3, 0.0  ;;  %v860_v46 = vadd.f32 %v859_v11, %v858_v20  ;;  %v820_v19 = vsel %vm550_vm5, %v804_v40, %v819_v7 }
 0x449   :  { %v871_v23 = vrot.slane %v870_v21, 4  ;;  %v778_v25 = vpop.permute.xlu0 %777  ;;  %v866_v39 = vrot.slane %v865_v22, 2 }
 0x44a   :  { %v839_v10 = vmul.f32 %v778_v25, %v1569_v14  ;;  %v808_v47 = vrot.slane %v778_v25, %v1619_v42  ;;  %v861_v56 = vrot.slane %v860_v46, 1 }
 0x44b   :  { %v872_v33 = vadd.f32 %v871_v23, %v870_v21  ;;  %v867_v50 = vadd.f32 %v866_v39, %v865_v22 }
 0x44c   :  { %v877_v37 = vsel %vm143_vm1, %v839_v10, 0.0  ;;  %v862_v2 = vadd.f32 %v861_v56, %v860_v46 }
 0x44d   :  { %v878_v41 = vrot.slane %v877_v37, 4  ;;  %v781_v43 = vpop.permute.xlu0 %780  ;;  %v873_v14 = vrot.slane %v872_v33, 2  ;;  %v868_v60 = vrot.slane %v867_v50, 1 }
 0x44e   :  { %v840_v48 = vmul.f32 %v781_v43, %v1571_v15  ;;  %v812_v45 = vrot.slane %v781_v43, %v1619_v42  ;;  %v821_v15 = vsel %vm552_vm6, %v808_v47, %v820_v19 }
 0x44f   :  { %v879_v4 = vadd.f32 %v878_v41, %v877_v37  ;;  %v874_v36 = vadd.f32 %v873_v14, %v872_v33  ;;  %v869_v12 = vadd.f32 %v868_v60, %v867_v50  ;;  %v1093_v37 = vld [vmem:[%s1763_s9] ss:$0 sm:$0xff]  ;;  %s1448_s9 = smov [#allocation15]  }
 0x450   :  { %v884_v49 = vsel %vm143_vm1, %v840_v48, 0.0  ;;  %v822_v55 = vsel %vm554_vm7, %v812_v45, %v821_v15  ;;  %s1066_s3 = sshll.u32 %s1448_s9, 4  ;;  %s1067_s3 = int_to_ptr.vmem [resolvable:$true] %s1066_s3 }
 0x451   :  { %v880_v27 = vrot.slane %v879_v4, 2  ;;  %v885_v28 = vrot.slane %v884_v49, 4  ;;  %v784_v32 = vpop.permute.xlu0 %783  ;;  %v875_v63 = vrot.slane %v874_v36, 1  ;;  %s1380_s15 = scalar_lea.vmem %s1067_s3, 128  ;;  %p1385_p8 = scmp.lt.s32.totalorder %s1067_s3, %s1067_s3 }
 0x452   :  { %v816_v51 = vrot.slane %v784_v32, %v1619_v42  ;;  %v841_v17 = vmul.f32 %v784_v32, %v1578_v16  ;;  %v855_v42 = vadd.f32 %v854_v52, %v853_v24  ;;  %p1381_p7 = scmp.ne.s32.totalorder %s1067_s3, %s1380_s15  ;;  %p1386_p9 = scmp.lt.s32.totalorder %s1380_s15, %s1380_s15 }
 0x453   :  { %v881_v53 = vadd.f32 %v880_v27, %v879_v4  ;;  %v886_v54 = vadd.f32 %v885_v28, %v884_v49  ;;  %v876_v3 = vadd.f32 %v875_v63, %v874_v36 }
 0x454   :  { %v891_v57 = vsel %vm143_vm1, %v841_v17, 0.0  ;;  %v823_v58 = vsel %vm556_vm8, %v816_v51, %v822_v55  ;;  %v906_v18 = vsel %vm544_vm2, %v855_v42, %v848_v9  ;;  %p1387_p10 = por %p1386_p9, %p1385_p8 }
 0x455   :  { %v887_v61 = vrot.slane %v886_v54, 2  ;;  %v892_v62 = vrot.slane %v891_v57, 4  ;;  %825 = vst.msk [vmem:[#allocation15] sm:$0xff] %vm559_vm9, %v823_v58  ;;  %v882_v1 = vrot.slane %v881_v53, 1  ;;  %v907_v21 = vsel %vm546_vm3, %v862_v2, %v906_v18  ;;  %v919_v33 = vpop.permute.xlu0 %918 }
 0x456   :  { %v908_v25 = vsel %vm548_vm4, %v869_v12, %v907_v21  ;;  %p1388_p11 = pnand %p1387_p10, %p1381_p7 }
 0x457   :  { %v888_v16 = vadd.f32 %v887_v61, %v886_v54  ;;  %v893_v0 = vadd.f32 %v892_v62, %v891_v57  ;;  %v883_v8 = vadd.f32 %v882_v1, %v881_v53  ;;  %v909_v26 = vsel %vm550_vm5, %v876_v3, %v908_v25 }
 0x459   :  { %v889_v6 = vrot.slane %v888_v16, 1  ;;  %v894_v13 = vrot.slane %v893_v0, 2  ;;  %v910_v29 = vsel %vm552_vm6, %v883_v8, %v909_v26 }
 0x45b   :  { %v895_v20 = vadd.f32 %v894_v13, %v893_v0  ;;  %v890_v22 = vadd.f32 %v889_v6, %v888_v16 }
 0x45d   :  { %v896_v23 = vrot.slane %v895_v20, 1  ;;  %v911_v31 = vsel %vm554_vm7, %v890_v22, %v910_v29 }
 0x45f   :  { %v897_v10 = vadd.f32 %v896_v23, %v895_v20 }
 0x461   :  { %v912_v34 = vsel %vm556_vm8, %v897_v10, %v911_v31 }
 0x462   :  { %v921_v11 = vsel %vm143_vm1, %v912_v34, %v916_v30 }
 0x463   :  { %v923_v35 = vsel %vm922_vm10, %v921_v11, %v919_v33 }
 0x464   :  { %1176 = vmatmul.mubr.msk.f32.vlgmr.msra.gmra.mxu0 %vm941_vm11, %v923_v35 }
 0x524   :  { %v1011_v39 = vpop.f32.mrf.mxu0 }
 0x525   :  { %v1012_v40 = vadd.f32 %v1093_v37, %v1011_v39 }
 0x526   :  { %v1177_v41 = vpop.f32.mrf.mxu0 }
 0x527   :  { %1232 = vtanh.f32 %v1012_v40  ;;  %v1095_v14 = vmul.f32 -1.442695, %v1012_v40 }
 0x529   :  { %1234 = vpow2.f32 %v1095_v14 }
 0x534   :  { %v1233_v43 = vpop.eup %1232 }
 0x535   :  { %1028 = vrot.lane.b32.xlu0 %v1233_v43, %s1447_s14 }
 0x536   :  { %v1235_v47 = vpop.eup %1234 }
 0x537   :  { %v1018_v48 = vadd.f32 1.0, %v1235_v47 }
 0x539   :  { %1023 = vrot.lane.b32.xlu0 %v137_v44, %s1445_s7  ;;  %1236 = vrcp.f32 %v1018_v48 }
 0x546   :  { %v1237_v24 = vpop.eup %1236 }
 0x5a7   :  { %v1029_v38 = vpop.permute.xlu0 %1028 }
 0x5a8   :  { %v1031_v4 = vmul.f32 %v1237_v24, %v1029_v38 }
 0x5aa   :  { %1033 = vrot.lane.b32.xlu0 %v1031_v4, %s1445_s7 }
 0x5ab   :  { %v1024_v45 = vpop.permute.xlu0 %1023 }
 0x5ac   :  { %v1026_v5 = vmul.f32 %v1237_v24, %v1024_v45 }
 0x61c   :  { %v1034_v46 = vpop.permute.xlu0 %1033 }
 0x61d   :  { %v1036_v7 = vadd.f32 %v1034_v46, %v1026_v5 }
 0x61f   :  { %1238 = vtanh.f32 %v1036_v7 }
 0x62c   :  { %v1239_v49 = vpop.eup %1238 }
 0x62d   :  { %1039 = vrot.lane.b32.xlu1 %v1239_v49, %s1447_s14 }
 0x62e   :  { %1391 = shalt.err (!%p1388_p11)
}
 0x62f   :  { %1069 = dma.vmem_to_hbm [thread:$0]  %s1067_s3, 128, %s1765_s11, [#allocation16]   ;;  %vm1048_vm12 = vcmask 523264  }
 0x630   :  { %s1449_s18 = smov [#allocation14]  }
 0x631   :  { %s1056_s19 = sshll.u32 %s1449_s18, 4  ;;  %s1057_s19 = int_to_ptr.vmem [resolvable:$true] %s1056_s19 }
 0x632   :  { %s1400_s20 = scalar_lea.vmem %s1057_s19, 128  ;;  %p1405_p13 = scmp.lt.s32.totalorder %s1057_s19, %s1057_s19 }
 0x633   :  { %p1401_p12 = scmp.ne.s32.totalorder %s1057_s19, %s1400_s20  ;;  %p1406_p0 = scmp.lt.s32.totalorder %s1400_s20, %s1400_s20 }
 0x635   :  { %p1407_p1 = por %p1406_p0, %p1405_p13 }
 0x637   :  { %p1408_p2 = pnand %p1407_p1, %p1401_p12 }
 0x69f   :  { %v1040_v50 = vpop.permute.xlu1 %1039 }
 0x6a0   :  { %v1042_v19 = vmul.f32 %v1237_v24, %v1040_v50 }
 0x6a2   :  { %1044 = vrot.lane.b32.xlu0 %v1042_v19, %s1445_s7 }
 0x714   :  { %v1045_v27 = vpop.permute.xlu0 %1044 }
 0x715   :  { %v1047_v28 = vsel %vm143_vm1, %v1045_v27, %v1036_v7 }
 0x716   :  { %1049 = vst.msk [vmem:[#allocation14] sm:$0xff] %vm1048_vm12, %v1047_v28 }
 0x717   :  { %1411 = shalt.err (!%p1408_p2)
}
 0x718   :  { %1059 = dma.vmem_to_hbm [thread:$0]  %s1057_s19, 128, %s1764_s10, [#allocation4]  }
 0x719   :  { %1428 = dma.done.wait [#allocation4], 128  }
 0x71a   :  { %1429 = vsyncadd [#allocation4], 4294967168 }
 0x71b   :  { %1430 = dma.done.wait [#allocation16], 128  }
 0x71c   :  { %1431 = vsyncadd [#allocation16], 4294967168 }
 0x71d   :  { %1076 = vsyncpa [#allocation3], 1 }
 0x71e   :  { %1077 = vsyncpa [#allocation6], 1 }
 0x71f   :  { %1078 = vsyncpa [#allocation9], 1 }
 0x720   :  { %1079 = vsyncpa [#allocation12], 1 }
 0x721   :  { %1080 = vsyncpa [#allocation4], 1 }
 0x722   :  { %1081 = vsyncpa [#allocation16], 1 }

</bundles_post_ra>
